<compile_context>
chip_gen: v6e
topology: v6e:2x2x1
jax: 0.10.0
libtpu: 0.0.40
codegen_flags: <defaults>
</compile_context>

<pallas_src>
import math

import jax
import jax.numpy as jnp
from jax.experimental import pallas as pl
from jax.experimental.pallas import tpu as pltpu


# --------------------------------------------------------------------------
# Pallas tiled matmul + bias kernel (MXU, bf16 inputs, f32 accumulator)
# --------------------------------------------------------------------------

def _matmul_bias_kernel(x_ref, w_ref, b_ref, o_ref, acc_ref):
    k = pl.program_id(2)

    @pl.when(k == 0)
    def _():
        acc_ref[...] = jnp.zeros_like(acc_ref)

    acc_ref[...] += jnp.dot(x_ref[...], w_ref[...],
                            preferred_element_type=jnp.float32)

    @pl.when(k == pl.num_programs(2) - 1)
    def _():
        o_ref[...] = (acc_ref[...] + b_ref[...]).astype(o_ref.dtype)


def _round_up(a, b):
    return (a + b - 1) // b * b


def pallas_linear(x2d, w, b=None, *, tm=256, tn=256, tk=512,
                  out_dtype=jnp.float32):
    """y = x2d @ w + b as a tiled, pipelined Pallas kernel.

    x2d: [M, K], w: [K, N], b: [N] or None -> [M, N] (out_dtype).
    """
    M, K = x2d.shape
    K2, N = w.shape
    assert K == K2

    # Shrink target tiles for small problems; keep everything (8,128)-aligned
    # and the lane (last) dims multiples of 128 (lane-dense stores / loads).
    tm = min(tm, _round_up(M, 128))
    tk = min(tk, _round_up(K, 128))
    tn = min(tn, _round_up(N, 128))
    Mp, Kp, Np = _round_up(M, tm), _round_up(K, tk), _round_up(N, tn)

    xp = jnp.pad(x2d, ((0, Mp - M), (0, Kp - K))).astype(jnp.bfloat16)
    wp = jnp.pad(w, ((0, Kp - K), (0, Np - N))).astype(jnp.bfloat16)
    if b is None:
        bp = jnp.zeros((1, Np), jnp.float32)
    else:
        bp = jnp.pad(b.reshape(1, N).astype(jnp.float32),
                     ((0, 0), (0, Np - N)))

    grid = (Mp // tm, Np // tn, Kp // tk)

    out = pl.pallas_call(
        _matmul_bias_kernel,
        out_shape=jax.ShapeDtypeStruct((Mp, Np), out_dtype),
        grid=grid,
        in_specs=[
            pl.BlockSpec((tm, tk), lambda i, j, k: (i, k)),
            pl.BlockSpec((tk, tn), lambda i, j, k: (k, j)),
            pl.BlockSpec((1, tn), lambda i, j, k: (0, j)),
        ],
        out_specs=pl.BlockSpec((tm, tn), lambda i, j, k: (i, j)),
        scratch_shapes=[pltpu.VMEM((tm, tn), jnp.float32)],
        compiler_params=pltpu.CompilerParams(
            dimension_semantics=("parallel", "parallel", "arbitrary"),
            vmem_limit_bytes=32 * 1024 * 1024,
        ),
        cost_estimate=pl.CostEstimate(
            flops=2 * Mp * Np * Kp,
            transcendentals=0,
            bytes_accessed=(Mp * Kp + Kp * Np) * 2 + Mp * Np * 4 + Np * 4,
        ),
    )(xp, wp, bp)
    return out[:M, :N]


def linear(x2d, w, b=None, use_pallas=True):
    """Size-based dispatch: tiny / lane-sparse problems (e.g. the conf head
    with N=1) use plain XLA dot -- pallas_call launch + DMA setup dominates
    there.  Both paths feed bf16 to the MXU and accumulate in f32."""
    M, K = x2d.shape
    N = w.shape[1]
    if (not use_pallas) or N < 32 or (M * K * N) < (1 << 15):
        y = jnp.dot(x2d.astype(jnp.bfloat16), w.astype(jnp.bfloat16),
                    preferred_element_type=jnp.float32)
        if b is not None:
            y = y + b.reshape(1, -1).astype(jnp.float32)
        return y
    return pallas_linear(x2d, w, b)


# --------------------------------------------------------------------------
# Token <-> map helpers (plain JAX scatter / gather)
# --------------------------------------------------------------------------

def token2map(x, loc_orig, idx_agg, map_size):
    """Scatter token features onto an (H, W) map (mean per grid cell)."""
    H, W = map_size
    B, N, C = x.shape
    loc = jnp.clip(loc_orig, -1.0, 1.0)
    col = jnp.clip(jnp.round((loc[..., 0] + 1.0) * 0.5 * W - 0.5),
                   0, W - 1).astype(jnp.int32)
    row = jnp.clip(jnp.round((loc[..., 1] + 1.0) * 0.5 * H - 0.5),
                   0, H - 1).astype(jnp.int32)
    idx_hw = row * W + col                                     # [B, N0]
    b_idx = jnp.arange(B)[:, None]
    v = x[b_idx, idx_agg]                                      # [B, N0, C]
    sums = jnp.zeros((B, H * W, C), jnp.float32).at[b_idx, idx_hw].add(v)
    cnt = jnp.zeros((B, H * W, 1), jnp.float32).at[b_idx, idx_hw].add(1.0)
    x_map = sums / jnp.maximum(cnt, 1.0)
    return x_map.reshape(B, H, W, C).transpose(0, 3, 1, 2)     # [B, C, H, W]


def map2token(x_map, num_tokens, loc_orig, idx_agg, agg_weight):
    """Sample the map at original locations, aggregate back per token.
    # TODO(synk): reference uses bilinear F.grid_sample; nearest-neighbour here.
    """
    B, C, H, W = x_map.shape
    loc = jnp.clip(loc_orig, -1.0, 1.0)
    col = jnp.clip(jnp.round((loc[..., 0] + 1.0) * 0.5 * W - 0.5),
                   0, W - 1).astype(jnp.int32)
    row = jnp.clip(jnp.round((loc[..., 1] + 1.0) * 0.5 * H - 0.5),
                   0, H - 1).astype(jnp.int32)
    idx_hw = row * W + col
    b_idx = jnp.arange(B)[:, None]
    feat = x_map.transpose(0, 2, 3, 1).reshape(B, H * W, C)
    sampled = feat[b_idx, idx_hw]                              # [B, N0, C]
    w = agg_weight.astype(jnp.float32)                         # [B, N0, 1]
    tok = jnp.zeros((B, num_tokens, C), jnp.float32).at[b_idx, idx_agg].add(
        sampled * w)
    wsum = jnp.zeros((B, num_tokens, 1), jnp.float32).at[b_idx, idx_agg].add(w)
    return tok / jnp.maximum(wsum, 1e-6)


def token_norm_bn(x, gamma, beta, eps=1e-5):
    """token_norm with a BN layer: BatchNorm over the channel dim of [B, N, C]
    (training-mode batch statistics, like BN2d on x.permute(0,2,1)[...,None])."""
    mean = jnp.mean(x, axis=(0, 1), keepdims=True)
    var = jnp.var(x, axis=(0, 1), keepdims=True)
    return (x - mean) * jax.lax.rsqrt(var + eps) * gamma + beta


def conv3x3_stride2(x_map, w, b, use_pallas=True):
    """3x3 / stride-2 / pad-1 conv as im2col + (Pallas) matmul."""
    B, C, H, W = x_map.shape
    Co = w.shape[0]
    H2, W2 = (H + 1) // 2, (W + 1) // 2
    xp = jnp.pad(x_map, ((0, 0), (0, 0), (1, 1), (1, 1)))
    cols = []
    for kh in range(3):
        for kw in range(3):
            cols.append(xp[:, :, kh:kh + 2 * H2 - 1:2, kw:kw + 2 * W2 - 1:2])
    patches = jnp.stack(cols, axis=2)                          # [B, C, 9, H2, W2]
    patches = patches.transpose(0, 3, 4, 1, 2).reshape(B * H2 * W2, C * 9)
    w2 = w.transpose(1, 2, 3, 0).reshape(C * 9, Co)            # (ci, kh, kw) order
    y = linear(patches, w2, b, use_pallas)                     # [B*H2*W2, Co]
    return y.reshape(B, H2, W2, Co).transpose(0, 3, 1, 2)


# --------------------------------------------------------------------------
# CTM_partpad_dict_BN forward
# --------------------------------------------------------------------------

class CTMPartpadDictBN:
    """JAX/Pallas port of CTM_partpad_dict_BN (cluster=True, cluster_type='skip').

    # TODO(synk): token_remerge_part / token_cluster_grid / token_downup (the
    # 'old'/'new'/grid clustering branches) are external helpers whose source is
    # not in the spec; the 'skip' branch (exact pass-through of x/idx_agg/
    # agg_weight) is reproduced instead.
    """

    def __init__(self, sample_ratio, embed_dim, dim_out, key,
                 k=5, nh_list=None, nw_list=None, level=0,
                 with_act=True, use_conf=True, remain_res=False,
                 cluster=True, cluster_type='skip'):
        self.sample_ratio = sample_ratio
        self.embed_dim = embed_dim
        self.dim_out = dim_out
        self.k = k
        self.nh_list = nh_list
        self.nw_list = nw_list or nh_list
        self.level = level
        self.with_act = with_act
        self.use_conf = use_conf
        self.remain_res = remain_res
        self.cluster = cluster
        self.cluster_type = cluster_type

        kc, kcb, ks, kq, kqb = jax.random.split(key, 5)
        bc = 1.0 / math.sqrt(embed_dim * 9)
        self.conv_w = jax.random.uniform(kc, (dim_out, embed_dim, 3, 3),
                                         jnp.float32, -bc, bc)
        self.conv_b = jax.random.uniform(kcb, (dim_out,), jnp.float32, -bc, bc)
        bs = 1.0 / math.sqrt(embed_dim)
        self.skip_w = jax.random.uniform(ks, (embed_dim, dim_out),
                                         jnp.float32, -bs, bs)    # no bias
        self.bn_gamma = jnp.ones((dim_out,), jnp.float32)
        self.bn_beta = jnp.zeros((dim_out,), jnp.float32)
        bq = 1.0 / math.sqrt(dim_out)
        self.conf_w = jax.random.uniform(kq, (dim_out, 1), jnp.float32, -bq, bq)
        self.conf_b = jax.random.uniform(kqb, (1,), jnp.float32, -bq, bq)

    def __call__(self, input_dict, use_pallas=True):
        input_dict = dict(input_dict)            # shallow copy, like .copy()
        x = input_dict['x']                      # [B, N, C]
        loc_orig = input_dict['loc_orig']        # [B, N0, 2]
        idx_agg = input_dict['idx_agg']          # [B, N0]
        agg_weight = input_dict['agg_weight']    # [B, N0, 1]
        H, W = input_dict['map_size']
        B, N, C = x.shape

        x_map = token2map(x, loc_orig, idx_agg, (H, W))                 # [B,C,H,W]
        x_map = conv3x3_stride2(x_map, self.conv_w, self.conv_b, use_pallas)
        x_tok = map2token(x_map, N, loc_orig, idx_agg, agg_weight)      # [B,N,Co]
        x_skip = linear(x.reshape(B * N, C), self.skip_w, None, use_pallas)
        x = x_tok + x_skip.reshape(B, N, self.dim_out)
        x = token_norm_bn(x, self.bn_gamma, self.bn_beta)

        if self.use_conf:
            conf = linear(x.reshape(B * N, self.dim_out), self.conf_w,
                          self.conf_b, use_pallas).reshape(B, N, 1)
            _weight = jnp.exp(conf)   # only consumed by the clustering branches
        else:
            conf = None

        input_dict['x'] = x

        # cluster_type == 'skip' branch of the reference module.
        x_down, idx_agg_down, agg_weight_down = x, idx_agg, agg_weight

        _, _, H2, W2 = x_map.shape
        input_dict['conf'] = conf
        if not self.remain_res:
            input_dict['map_size'] = [H2, W2]

        out_dict = {'x': x_down, 'idx_agg': idx_agg_down,
                    'agg_weight': agg_weight_down, 'loc_orig': loc_orig,
                    'map_size': [H2, W2]}
        if self.with_act:
            out_dict['x'] = jax.nn.relu(out_dict['x'])
            input_dict['x'] = jax.nn.relu(input_dict['x'])
        if self.use_conf:
            return out_dict, input_dict
        return out_dict


# --------------------------------------------------------------------------
# main
# --------------------------------------------------------------------------

if __name__ == "__main__":
    key = jax.random.PRNGKey(0)
    k_x, k_params = jax.random.split(key)

    B, H, W = 2, 16, 16
    embed_dim, dim_out = 32, 64
    N0 = H * W                                   # 256 grid points == tokens

    x = jax.random.normal(k_x, (B, N0, embed_dim), jnp.float32)
    ys = (jnp.arange(H, dtype=jnp.float32) + 0.5) / H * 2.0 - 1.0
    xs = (jnp.arange(W, dtype=jnp.float32) + 0.5) / W * 2.0 - 1.0
    gy, gx = jnp.meshgrid(ys, xs, indexing="ij")
    loc = jnp.stack([gx.reshape(-1), gy.reshape(-1)], axis=-1)   # [N0, 2] (x,y)
    loc_orig = jnp.broadcast_to(loc, (B, N0, 2))
    idx_agg = jnp.broadcast_to(jnp.arange(N0, dtype=jnp.int32), (B, N0))
    agg_weight = jnp.ones((B, N0, 1), jnp.float32)

    input_dict = {'x': x, 'loc_orig': loc_orig, 'idx_agg': idx_agg,
                  'agg_weight': agg_weight, 'map_size': [H, W]}

    model = CTMPartpadDictBN(sample_ratio=0.25, embed_dim=embed_dim,
                             dim_out=dim_out, key=k_params,
                             nh_list=[1, 1, 1], nw_list=[1, 1, 1])

    out_dict, updated_dict = model(input_dict, use_pallas=True)
    jax.block_until_ready(out_dict['x'])

    # Reference: identical forward with plain XLA dots (same bf16 casts), so the
    # only difference is the Pallas MXU path vs XLA's dot.
    out_ref, updated_ref = model(input_dict, use_pallas=False)

    assert out_dict['x'].shape == (B, N0, dim_out)
    assert out_dict['map_size'] == [H // 2, W // 2]
    assert bool(jnp.all(jnp.isfinite(out_dict['x'])))
    assert jnp.allclose(out_dict['x'], out_ref['x'], atol=2e-2, rtol=2e-2)
    assert jnp.allclose(updated_dict['x'], updated_ref['x'], atol=2e-2, rtol=2e-2)
    assert jnp.allclose(updated_dict['conf'], updated_ref['conf'],
                        atol=2e-2, rtol=2e-2)

    print("KERNEL_OK")
</pallas_src>

<mosaic_0001>
module attributes {stable_mosaic.version = 11 : i64} {
  func.func @_matmul_bias_kernel(%arg0: i32, %arg1: i32, %arg2: i32, %arg3: memref<128x384xbf16, #tpu.memory_space<vmem>>, %arg4: memref<384x128xbf16, #tpu.memory_space<vmem>>, %arg5: memref<1x128xf32, #tpu.memory_space<vmem>>, %arg6: memref<128x128xf32, #tpu.memory_space<vmem>>, %arg7: memref<128x128xf32, #tpu.memory_space<vmem>>) attributes {dimension_semantics = [#tpu.dimension_semantics<parallel>, #tpu.dimension_semantics<parallel>, #tpu.dimension_semantics<arbitrary>], iteration_bounds = array<i64: 1, 1, 1>, scalar_prefetch = 0 : i64, scratch_operands = 1 : i64, tpu.core_type = #tpu.core_type<tc>, window_params = [{transform_indices = @transform_0, window_bounds = array<i64: 128, 384>}, {transform_indices = @transform_1, window_bounds = array<i64: 384, 128>}, {transform_indices = @transform_2, window_bounds = array<i64: 1, 128>}, {transform_indices = @transform_3, window_bounds = array<i64: 128, 128>}]} {
    %c0_i32 = arith.constant 0 : i32
    %0 = arith.cmpi eq, %arg2, %c0_i32 : i32
    %1 = arith.extui %0 : i1 to i32
    %c0_i32_0 = arith.constant 0 : i32
    %2 = arith.cmpi ne, %1, %c0_i32_0 : i32
    scf.if %2 {
      %cst_10 = arith.constant 0.000000e+00 : f32
      %12 = vector.broadcast %cst_10 : f32 to vector<128x128xf32>
      %c0_11 = arith.constant 0 : index
      %c0_12 = arith.constant 0 : index
      %13 = vector.load %arg7[%c0_11, %c0_12] : memref<128x128xf32, #tpu.memory_space<vmem>>, vector<128x128xf32>
      tpu.vector_store %arg7[%c0_11, %c0_12], %12 {strides = array<i32>} : memref<128x128xf32, #tpu.memory_space<vmem>>, vector<128x128xf32>,
    } else {
    }
    %c0 = arith.constant 0 : index
    %c0_1 = arith.constant 0 : index
    %3 = vector.load %arg7[%c0, %c0_1] : memref<128x128xf32, #tpu.memory_space<vmem>>, vector<128x128xf32>
    %c0_2 = arith.constant 0 : index
    %c0_3 = arith.constant 0 : index
    %4 = vector.load %arg3[%c0_2, %c0_3] : memref<128x384xbf16, #tpu.memory_space<vmem>>, vector<128x384xbf16>
    %c0_4 = arith.constant 0 : index
    %c0_5 = arith.constant 0 : index
    %5 = vector.load %arg4[%c0_4, %c0_5] : memref<384x128xbf16, #tpu.memory_space<vmem>>, vector<384x128xbf16>
    %cst = arith.constant dense<0.000000e+00> : vector<128x128xf32>
    %6 = tpu.matmul %4, %5, %cst {dimension_numbers = #tpu.dot_dimension_numbers<[1], [0], [0], [1], [0, 0, 1, 1], [], []>} : vector<128x384xbf16>, vector<384x128xbf16>, vector<128x128xf32> -> vector<128x128xf32>
    %7 = arith.addf %3, %6 : vector<128x128xf32>
    %c0_6 = arith.constant 0 : index
    %c0_7 = arith.constant 0 : index
    %8 = vector.load %arg7[%c0_6, %c0_7] : memref<128x128xf32, #tpu.memory_space<vmem>>, vector<128x128xf32>
    tpu.vector_store %arg7[%c0_6, %c0_7], %7 {strides = array<i32>} : memref<128x128xf32, #tpu.memory_space<vmem>>, vector<128x128xf32>,
    %c0_i32_8 = arith.constant 0 : i32
    %9 = arith.cmpi eq, %arg2, %c0_i32_8 : i32
    %10 = arith.extui %9 : i1 to i32
    %c0_i32_9 = arith.constant 0 : i32
    %11 = arith.cmpi ne, %10, %c0_i32_9 : i32
    scf.if %11 {
      %c0_10 = arith.constant 0 : index
      %c0_11 = arith.constant 0 : index
      %12 = vector.load %arg7[%c0_10, %c0_11] : memref<128x128xf32, #tpu.memory_space<vmem>>, vector<128x128xf32>
      %c0_12 = arith.constant 0 : index
      %c0_13 = arith.constant 0 : index
      %13 = vector.load %arg5[%c0_12, %c0_13] : memref<1x128xf32, #tpu.memory_space<vmem>>, vector<1x128xf32>
      %14 = vector.broadcast %13 : vector<1x128xf32> to vector<128x128xf32>
      %15 = arith.addf %12, %14 : vector<128x128xf32>
      %c0_14 = arith.constant 0 : index
      %c0_15 = arith.constant 0 : index
      %16 = vector.load %arg6[%c0_14, %c0_15] : memref<128x128xf32, #tpu.memory_space<vmem>>, vector<128x128xf32>
      tpu.vector_store %arg6[%c0_14, %c0_15], %15 {strides = array<i32>} : memref<128x128xf32, #tpu.memory_space<vmem>>, vector<128x128xf32>,
    } else {
    }
    return
  }
  func.func @transform_0(%arg0: i32, %arg1: i32, %arg2: i32) -> (i32, i32) {
    %c0_i32 = arith.constant 0 : i32
    return %arg0, %arg2 : i32, i32
  }
  func.func @transform_1(%arg0: i32, %arg1: i32, %arg2: i32) -> (i32, i32) {
    %c0_i32 = arith.constant 0 : i32
    return %arg2, %arg1 : i32, i32
  }
  func.func @transform_2(%arg0: i32, %arg1: i32, %arg2: i32) -> (i32, i32) {
    %c0_i32 = arith.constant 0 : i32
    %c0_i32_0 = arith.constant 0 : i32
    return %c0_i32, %arg1 : i32, i32
  }
  func.func @transform_3(%arg0: i32, %arg1: i32, %arg2: i32) -> (i32, i32) {
    %c0_i32 = arith.constant 0 : i32
    return %arg0, %arg1 : i32, i32
  }
}

</mosaic_0001>

<bundles_post_ra>
// kernel: tpu_custom_call.1
= control target key start
LH: loop header
LB: loop body
LE: loop exit
PB: predicated region body
PF: predicated region fallthrough
CT: control target
= control target key end

     0   :  { %8 = vsyncpa [#allocation4], 0  ;;  %s1085_s0 = inlined_call_operand.hbm [shape: bf16[128,384], index: 0, kind: input, shape index: {}]   ;;  %s1086_s1 = inlined_call_operand.hbm [shape: bf16[384,128], index: 1, kind: input, shape index: {}]   ;;  %s1087_s2 = inlined_call_operand.vmem [shape: f32[1,128], index: 2, kind: input, shape index: {}]   ;;  %s1088_s3 = inlined_call_operand.hbm [shape: f32[128,128], index: 3, kind: output, shape index: {}]  }
   0x1   :  { %9 = vsyncpa [#allocation7], 0 }
   0x2   :  { %10 = vsyncpa [#allocation5], 0  ;;  %s1026_s12 = smov [#allocation3]  }
   0x3   :  { %s16_s13 = sshll.u32 %s1026_s12, 4  ;;  %s17_s13 = int_to_ptr.vmem [resolvable:$true] %s16_s13 }
   0x4   :  { %s968_s14 = scalar_lea.vmem %s17_s13, 3072  ;;  %p973_p1 = scmp.lt.s32.totalorder %s17_s13, %s17_s13 }
   0x5   :  { %p969_p0 = scmp.ne.s32.totalorder %s17_s13, %s968_s14  ;;  %p974_p2 = scmp.lt.s32.totalorder %s968_s14, %s968_s14 }
   0x7   :  { %p975_p3 = por %p974_p2, %p973_p1 }
   0x9   :  { %p976_p4 = pnand %p975_p3, %p969_p0 }
   0xb   :  { %979 = shalt.err (!%p976_p4)
}
   0xc   :  { %s1027_s15 = smov 192   ;;  %s1028_s16 = smov 12  }
   0xd   :  { %22 = dma.hbm_to_vmem [thread:$0]  %s1085_s0, 3072, %s17_s13, [#allocation4], %s1027_s15, %s1027_s15, %s1028_s16  }
   0xe   :  { %s1029_s19 = smov [#allocation6]  }
   0xf   :  { %s28_s20 = sshll.u32 %s1029_s19, 4  ;;  %s29_s20 = int_to_ptr.vmem [resolvable:$true] %s28_s20 }
  0x10   :  { %s988_s21 = scalar_lea.vmem %s29_s20, 3072  ;;  %p993_p6 = scmp.lt.s32.totalorder %s29_s20, %s29_s20 }
  0x11   :  { %p989_p5 = scmp.ne.s32.totalorder %s29_s20, %s988_s21  ;;  %p994_p7 = scmp.lt.s32.totalorder %s988_s21, %s988_s21 }
  0x13   :  { %p995_p8 = por %p994_p7, %p993_p6 }
  0x15   :  { %p996_p9 = pnand %p995_p8, %p989_p5 }
  0x17   :  { %999 = shalt.err (!%p996_p9)
}
  0x18   :  { %s1030_s22 = smov 64   ;;  %s1031_s23 = smov 4  }
  0x19   :  { %34 = dma.hbm_to_vmem [thread:$0]  %s1086_s1, 3072, %s29_s20, [#allocation7], %s1030_s22, %s1030_s22, %s1031_s23  }
  0x1a   :  { %1020 = dma.done.wait [#allocation4], 3072  }
  0x1b   :  { %1021 = vsyncadd [#allocation4], 4294964224 }
  0x1c   :  { %1022 = dma.done.wait [#allocation7], 3072  }
  0x1d   :  { %1023 = vsyncadd [#allocation7], 4294964224  ;;  %v904_v0 = vld [vmem:[#allocation6 + $0x78] sm:$0xff]   ;;  %v907_v3 = vld [vmem:[#allocation6 + $0x70] sm:$0xff]  }
  0x1e   :  { %v905_v1 = vld [vmem:[#allocation6 + $0x38] sm:$0xff]   ;;  %783 = vmatprep.subr.bf16.mxu0 %v904_v0  ;;  %v908_v4 = vld [vmem:[#allocation6 + $0x30] sm:$0xff]   ;;  %v910_v6 = vld [vmem:[#allocation6 + $0x68] sm:$0xff]  }
  0x1f   :  { %v906_v2 = vld [vmem:[#allocation6 + $0xb8] sm:$0xff]   ;;  %784 = vmatpush3.bf16.msra.mxu0 %v905_v1  ;;  %v909_v5 = vld [vmem:[#allocation6 + $0xb0] sm:$0xff]   ;;  %v911_v7 = vld [vmem:[#allocation6 + $0x28] sm:$0xff]  }
  0x20   :  { %863 = vmatprep.subr.bf16.mxu1 %v906_v2  ;;  %785 = vmatprep.subr.bf16.mxu0 %v907_v3  ;;  %v912_v8 = vld [vmem:[#allocation6 + $0xa8] sm:$0xff]   ;;  %v913_v9 = vld [vmem:[#allocation6 + $0x60] sm:$0xff]   ;;  %v916_v12 = vld [vmem:[#allocation6 + $0x58] sm:$0xff]  }
  0x21   :  { %864 = vmatpush3.bf16.msra.mxu1 %v906_v2  ;;  %v914_v10 = vld [vmem:[#allocation6 + $0x20] sm:$0xff]   ;;  %v918_v13 = vld [vmem:[#allocation6 + $0x98] sm:$0xff]   ;;  %v919_v15 = vld [vmem:[#allocation6 + $0x50] sm:$0xff]  }
  0x22   :  { %865 = vmatprep.subr.bf16.mxu1 %v909_v5  ;;  %v915_v11 = vld [vmem:[#allocation6 + $0xa0] sm:$0xff]   ;;  %v917_v14 = vld [vmem:[#allocation6 + $0x18] sm:$0xff]   ;;  %v921_v16 = vld [vmem:[#allocation6 + $0x90] sm:$0xff]  }
  0x23   :  { %786 = vmatpush3.bf16.msra.mxu0 %v908_v4  ;;  %v920_v17 = vld [vmem:[#allocation6 + $0x10] sm:$0xff]   ;;  %v922_v18 = vld [vmem:[#allocation6 + $0x48] sm:$0xff]   ;;  %v925_v21 = vld [vmem:[#allocation6 + $0x40] sm:$0xff]  }
  0x24   :  { %787 = vmatprep.subr.bf16.mxu0 %v910_v6  ;;  %v923_v19 = vld [vmem:[#allocation6 + $0x8] sm:$0xff]   ;;  %v927_v22 = vld [vmem:[#allocation6 + $0x80] sm:$0xff]   ;;  %v940_v32 = vld [vmem:[#allocation3 + $0x50] ss:$12 sps:$4 sm:$0xff]  }
  0x25   :  { %866 = vmatpush3.bf16.msra.mxu1 %v909_v5  ;;  %v924_v20 = vld [vmem:[#allocation6 + $0x88] sm:$0xff]   ;;  %v930_v23 = vld [vmem:[#allocation3 + $0x4] ss:$12 sps:$4 sm:$0xff]   ;;  %v936_v31 = vld [vmem:[#allocation3 + $0x34] ss:$12 sps:$4 sm:$0xff]  }
  0x26   :  { %867 = vmatprep.subr.bf16.mxu1 %v912_v8  ;;  %v931_v24 = vld [vmem:[#allocation3 + $0x8] ss:$12 sps:$4 sm:$0xff]   ;;  %v926_v25 = vld [vmem:[#allocation6] sm:$0xff]   ;;  %464 = vmatprep.mubr.bf16.mxu0 %v930_v23  ;;  %v938_v34 = vld [vmem:[#allocation3 + $0x30] ss:$12 sps:$4 sm:$0xff]  }
  0x27   :  { %788 = vmatpush3.bf16.msra.mxu0 %v911_v7  ;;  %879 = vmatprep.mubr.bf16.mxu1 %v931_v24  ;;  %v928_v26 = vld [vmem:[#allocation3] ss:$12 sps:$4 sm:$0xff]   ;;  %v933_v27 = vld [vmem:[#allocation3 + $0x1c] ss:$12 sps:$4 sm:$0xff]   ;;  %v939_v29 = vld [vmem:[#allocation3 + $0x38] ss:$12 sps:$4 sm:$0xff]  }
  0x28   :  { %789 = vmatprep.subr.bf16.mxu0 %v913_v9  ;;  %v932_v28 = vld [vmem:[#allocation3 + $0x20] ss:$12 sps:$4 sm:$0xff]   ;;  %v935_v30 = vld [vmem:[#allocation3 + $0x18] ss:$12 sps:$4 sm:$0xff]   ;;  %v947_v33 = vld [vmem:[#allocation3 + $0x68] ss:$12 sps:$4 sm:$0xff]  }
  0x29   :  { %868 = vmatpush3.bf16.msra.mxu1 %v912_v8  ;;  %v941_v35 = vld [vmem:[#allocation3 + $0x4c] ss:$12 sps:$4 sm:$0xff]   ;;  %v943_v38 = vld [vmem:[#allocation3 + $0x48] ss:$12 sps:$4 sm:$0xff]   ;;  %v944_v39 = vld [vmem:[#allocation3 + $0x64] ss:$12 sps:$4 sm:$0xff]  }
  0x2a   :  { %869 = vmatprep.subr.bf16.mxu1 %v915_v11  ;;  %v948_v36 = vld [vmem:[#allocation3 + $0x80] ss:$12 sps:$4 sm:$0xff]   ;;  %v955_v37 = vld [vmem:[#allocation3 + $0x98] ss:$12 sps:$4 sm:$0xff]   ;;  %v956_v40 = vld [vmem:[#allocation3 + $0xb0] ss:$12 sps:$4 sm:$0xff]  }
  0x2b   :  { %790 = vmatpush3.bf16.msra.mxu0 %v914_v10  ;;  %v946_v41 = vld [vmem:[#allocation3 + $0x60] ss:$12 sps:$4 sm:$0xff]   ;;  %v949_v42 = vld [vmem:[#allocation3 + $0x7c] ss:$12 sps:$4 sm:$0xff]   ;;  %v951_v43 = vld [vmem:[#allocation3 + $0x78] ss:$12 sps:$4 sm:$0xff]  }
  0x2c   :  { %791 = vmatprep.subr.bf16.mxu0 %v916_v12  ;;  %v952_v44 = vld [vmem:[#allocation3 + $0x94] ss:$12 sps:$4 sm:$0xff]   ;;  %v954_v45 = vld [vmem:[#allocation3 + $0x90] ss:$12 sps:$4 sm:$0xff]   ;;  %v957_v46 = vld [vmem:[#allocation3 + $0xac] ss:$12 sps:$4 sm:$0xff]  }
  0x2d   :  { %870 = vmatpush3.bf16.msra.mxu1 %v915_v11  ;;  %v959_v47 = vld [vmem:[#allocation3 + $0xa8] ss:$12 sps:$4 sm:$0xff]   ;;  %v1064_v54 = vld [vmem:[%s1087_s2] ss:$0 sm:$0xff]  ;;  %s1032_s2 = smov [#allocation8]  }
  0x2e   :  { %871 = vmatprep.subr.bf16.mxu1 %v918_v13  ;;  %s721_s26 = sshll.u32 %s1032_s2, 4  ;;  %s722_s26 = int_to_ptr.vmem [resolvable:$true] %s721_s26 }
  0x2f   :  { %792 = vmatpush3.bf16.msra.mxu0 %v917_v14  ;;  %s1000_s27 = scalar_lea.vmem %s722_s26, 2048  ;;  %p1005_p11 = scmp.lt.s32.totalorder %s722_s26, %s722_s26 }
  0x30   :  { %793 = vmatprep.subr.bf16.mxu0 %v919_v15  ;;  %p1001_p10 = scmp.ne.s32.totalorder %s722_s26, %s1000_s27  ;;  %p1006_p12 = scmp.lt.s32.totalorder %s1000_s27, %s1000_s27 }
  0x31   :  { %872 = vmatpush3.bf16.msra.mxu1 %v918_v13 }
  0x32   :  { %873 = vmatprep.subr.bf16.mxu1 %v921_v16  ;;  %p1007_p13 = por %p1006_p12, %p1005_p11 }
  0x33   :  { %794 = vmatpush3.bf16.msra.mxu0 %v920_v17 }
  0x34   :  { %795 = vmatprep.subr.bf16.mxu0 %v922_v18  ;;  %p1008_p0 = pnand %p1007_p13, %p1001_p10 }
  0x35   :  { %874 = vmatpush3.bf16.msra.mxu1 %v921_v16 }
  0x36   :  { %875 = vmatprep.subr.bf16.mxu1 %v924_v20 }
  0x37   :  { %796 = vmatpush3.bf16.msra.mxu0 %v923_v19 }
  0x38   :  { %797 = vmatprep.subr.bf16.mxu0 %v925_v21 }
  0x39   :  { %876 = vmatpush3.bf16.msra.mxu1 %v924_v20 }
  0x3a   :  { %877 = vmatprep.subr.bf16.mxu1 %v927_v22 }
  0x3b   :  { %798 = vmatpush3.bf16.msra.mxu0 %v926_v25 }
  0x3d   :  { %878 = vmatpush3.bf16.msra.mxu1 %v927_v22 }
  0x3e   :  { %465 = vmatmul.mubr.bf16.vlgmr.msra.gmra.mxu0 %v928_v26 }
  0x3f   :  { %472 = vmatprep.mubr.bf16.mxu0 %v933_v27 }
  0x40   :  { %880 = vmatmul.mubr.bf16.vlgmr.msra.gmra.mxu1 %v932_v28 }
  0x41   :  { %883 = vmatprep.mubr.bf16.mxu1 %v939_v29 }
  0x46   :  { %473 = vmatmul.mubr.bf16.gmra.mxu0 %v935_v30 }
  0x47   :  { %480 = vmatprep.mubr.bf16.mxu0 %v936_v31 }
  0x48   :  { %884 = vmatmul.mubr.bf16.gmra.mxu1 %v940_v32 }
  0x49   :  { %887 = vmatprep.mubr.bf16.mxu1 %v947_v33 }
  0x4e   :  { %481 = vmatmul.mubr.bf16.gmra.mxu0 %v938_v34 }
  0x4f   :  { %488 = vmatprep.mubr.bf16.mxu0 %v941_v35 }
  0x50   :  { %888 = vmatmul.mubr.bf16.gmra.mxu1 %v948_v36 }
  0x51   :  { %891 = vmatprep.mubr.bf16.mxu1 %v955_v37 }
  0x56   :  { %489 = vmatmul.mubr.bf16.gmra.mxu0 %v943_v38 }
  0x57   :  { %496 = vmatprep.mubr.bf16.mxu0 %v944_v39 }
  0x58   :  { %892 = vmatmul.mubr.bf16.gmra.mxu1 %v956_v40 }
  0x5e   :  { %497 = vmatmul.mubr.bf16.gmra.mxu0 %v946_v41 }
  0x5f   :  { %504 = vmatprep.mubr.bf16.mxu0 %v949_v42 }
  0x66   :  { %505 = vmatmul.mubr.bf16.gmra.mxu0 %v951_v43 }
  0x67   :  { %512 = vmatprep.mubr.bf16.mxu0 %v952_v44 }
  0x6e   :  { %513 = vmatmul.mubr.bf16.gmra.mxu0 %v954_v45 }
  0x6f   :  { %520 = vmatprep.mubr.bf16.mxu0 %v957_v46 }
  0x76   :  { %521 = vmatmul.mubr.bf16.gmra.mxu0 %v959_v47 }
  0xfe   :  { %v799_v48 = vpop.f32.mrf.mxu0 }
 0x100   :  { %v800_v49 = vpop.f32.mrf.mxu0  ;;  %v881_v50 = vpop.f32.mrf.mxu1 }
 0x101   :  { %v801_v51 = vadd.f32 %v800_v49, %v799_v48 }
 0x102   :  { %v802_v52 = vpop.f32.mrf.mxu0  ;;  %v563_v53 = vpop.f32.mrf.mxu1 }
 0x103   :  { %v564_v55 = vadd.f32 %v801_v51, %v563_v53 }
 0x104   :  { %v803_v56 = vpop.f32.mrf.mxu0  ;;  %v882_v57 = vpop.f32.mrf.mxu1 }
 0x105   :  { %v684_v58 = vadd.f32 %v1064_v54, %v564_v55  ;;  %v804_v59 = vadd.f32 %v803_v56, %v802_v52 }
 0x106   :  { %v805_v60 = vpop.f32.mrf.mxu0  ;;  %v566_v61 = vpop.f32.mrf.mxu1 }
 0x107   :  { %700 = vst [vmem:[#allocation8] sm:$0xff] %v684_v58  ;;  %v567_v62 = vadd.f32 %v804_v59, %v566_v61 }
 0x108   :  { %v806_v63 = vpop.f32.mrf.mxu0  ;;  %v885_v0 = vpop.f32.mrf.mxu1 }
 0x109   :  { %v685_v1 = vadd.f32 %v1064_v54, %v567_v62  ;;  %v807_v2 = vadd.f32 %v806_v63, %v805_v60 }
 0x10a   :  { %v808_v3 = vpop.f32.mrf.mxu0  ;;  %v579_v6 = vpop.f32.mrf.mxu1 }
 0x10b   :  { %701 = vst [vmem:[#allocation8 + $0x8] sm:$0xff] %v685_v1  ;;  %v572_v4 = vadd.f32 %v881_v50, %v807_v2 }
 0x10c   :  { %v809_v5 = vpop.f32.mrf.mxu0  ;;  %v886_v12 = vpop.f32.mrf.mxu1 }
 0x10d   :  { %v686_v7 = vadd.f32 %v1064_v54, %v572_v4  ;;  %v810_v8 = vadd.f32 %v809_v5, %v808_v3 }
 0x10e   :  { %v811_v9 = vpop.f32.mrf.mxu0  ;;  %v582_v18 = vpop.f32.mrf.mxu1 }
 0x10f   :  { %702 = vst [vmem:[#allocation8 + $0x10] sm:$0xff] %v686_v7  ;;  %v575_v10 = vadd.f32 %v882_v57, %v810_v8 }
 0x110   :  { %v812_v11 = vpop.f32.mrf.mxu0  ;;  %v889_v24 = vpop.f32.mrf.mxu1 }
 0x111   :  { %v687_v13 = vadd.f32 %v1064_v54, %v575_v10  ;;  %v813_v14 = vadd.f32 %v812_v11, %v811_v9 }
 0x112   :  { %v814_v15 = vpop.f32.mrf.mxu0  ;;  %v595_v30 = vpop.f32.mrf.mxu1 }
 0x113   :  { %703 = vst [vmem:[#allocation8 + $0x18] sm:$0xff] %v687_v13  ;;  %v580_v16 = vadd.f32 %v813_v14, %v579_v6 }
 0x114   :  { %v815_v17 = vpop.f32.mrf.mxu0  ;;  %v890_v36 = vpop.f32.mrf.mxu1 }
 0x115   :  { %v688_v19 = vadd.f32 %v1064_v54, %v580_v16  ;;  %v816_v20 = vadd.f32 %v815_v17, %v814_v15 }
 0x116   :  { %v817_v21 = vpop.f32.mrf.mxu0  ;;  %v598_v42 = vpop.f32.mrf.mxu1 }
 0x117   :  { %704 = vst [vmem:[#allocation8 + $0x20] sm:$0xff] %v688_v19  ;;  %v583_v22 = vadd.f32 %v816_v20, %v582_v18 }
 0x118   :  { %v818_v23 = vpop.f32.mrf.mxu0  ;;  %v893_v48 = vpop.f32.mrf.mxu1 }
 0x119   :  { %v689_v25 = vadd.f32 %v1064_v54, %v583_v22  ;;  %v819_v26 = vadd.f32 %v818_v23, %v817_v21 }
 0x11a   :  { %v820_v27 = vpop.f32.mrf.mxu0  ;;  %v611_v55 = vpop.f32.mrf.mxu1 }
 0x11b   :  { %705 = vst [vmem:[#allocation8 + $0x28] sm:$0xff] %v689_v25  ;;  %v588_v28 = vadd.f32 %v885_v0, %v819_v26 }
 0x11c   :  { %v821_v29 = vpop.f32.mrf.mxu0  ;;  %v894_v61 = vpop.f32.mrf.mxu1 }
 0x11d   :  { %v690_v31 = vadd.f32 %v1064_v54, %v588_v28  ;;  %v822_v32 = vadd.f32 %v821_v29, %v820_v27 }
 0x11e   :  { %v823_v33 = vpop.f32.mrf.mxu0  ;;  %v614_v3 = vpop.f32.mrf.mxu1 }
 0x11f   :  { %706 = vst [vmem:[#allocation8 + $0x30] sm:$0xff] %v690_v31  ;;  %v591_v34 = vadd.f32 %v886_v12, %v822_v32 }
 0x120   :  { %v824_v35 = vpop.f32.mrf.mxu0 }
 0x121   :  { %v691_v37 = vadd.f32 %v1064_v54, %v591_v34  ;;  %v825_v38 = vadd.f32 %v824_v35, %v823_v33 }
 0x122   :  { %v826_v39 = vpop.f32.mrf.mxu0 }
 0x123   :  { %707 = vst [vmem:[#allocation8 + $0x38] sm:$0xff] %v691_v37  ;;  %v596_v40 = vadd.f32 %v825_v38, %v595_v30 }
 0x124   :  { %v827_v41 = vpop.f32.mrf.mxu0 }
 0x125   :  { %v692_v43 = vadd.f32 %v1064_v54, %v596_v40  ;;  %v828_v44 = vadd.f32 %v827_v41, %v826_v39 }
 0x126   :  { %v829_v45 = vpop.f32.mrf.mxu0 }
 0x127   :  { %708 = vst [vmem:[#allocation8 + $0x40] sm:$0xff] %v692_v43  ;;  %v599_v46 = vadd.f32 %v828_v44, %v598_v42 }
 0x128   :  { %v830_v47 = vpop.f32.mrf.mxu0 }
 0x129   :  { %v693_v49 = vadd.f32 %v1064_v54, %v599_v46  ;;  %v831_v50 = vadd.f32 %v830_v47, %v829_v45 }
 0x12a   :  { %v832_v51 = vpop.f32.mrf.mxu0 }
 0x12b   :  { %709 = vst [vmem:[#allocation8 + $0x48] sm:$0xff] %v693_v49  ;;  %v604_v52 = vadd.f32 %v889_v24, %v831_v50 }
 0x12c   :  { %v833_v53 = vpop.f32.mrf.mxu0 }
 0x12d   :  { %v694_v56 = vadd.f32 %v1064_v54, %v604_v52  ;;  %v834_v57 = vadd.f32 %v833_v53, %v832_v51 }
 0x12e   :  { %v835_v58 = vpop.f32.mrf.mxu0 }
 0x12f   :  { %710 = vst [vmem:[#allocation8 + $0x50] sm:$0xff] %v694_v56  ;;  %v607_v59 = vadd.f32 %v890_v36, %v834_v57 }
 0x130   :  { %v836_v60 = vpop.f32.mrf.mxu0 }
 0x131   :  { %v695_v62 = vadd.f32 %v1064_v54, %v607_v59  ;;  %v837_v63 = vadd.f32 %v836_v60, %v835_v58 }
 0x132   :  { %v838_v0 = vpop.f32.mrf.mxu0 }
 0x133   :  { %711 = vst [vmem:[#allocation8 + $0x58] sm:$0xff] %v695_v62  ;;  %v612_v1 = vadd.f32 %v837_v63, %v611_v55 }
 0x134   :  { %v839_v2 = vpop.f32.mrf.mxu0 }
 0x135   :  { %v696_v4 = vadd.f32 %v1064_v54, %v612_v1  ;;  %v840_v5 = vadd.f32 %v839_v2, %v838_v0 }
 0x136   :  { %v841_v6 = vpop.f32.mrf.mxu0 }
 0x137   :  { %712 = vst [vmem:[#allocation8 + $0x60] sm:$0xff] %v696_v4  ;;  %v615_v7 = vadd.f32 %v840_v5, %v614_v3 }
 0x138   :  { %v842_v8 = vpop.f32.mrf.mxu0 }
 0x139   :  { %v697_v9 = vadd.f32 %v1064_v54, %v615_v7  ;;  %v843_v10 = vadd.f32 %v842_v8, %v841_v6 }
 0x13a   :  { %v844_v11 = vpop.f32.mrf.mxu0 }
 0x13b   :  { %713 = vst [vmem:[#allocation8 + $0x68] sm:$0xff] %v697_v9  ;;  %v620_v12 = vadd.f32 %v893_v48, %v843_v10 }
 0x13c   :  { %v845_v13 = vpop.f32.mrf.mxu0 }
 0x13d   :  { %v698_v14 = vadd.f32 %v1064_v54, %v620_v12  ;;  %v846_v15 = vadd.f32 %v845_v13, %v844_v11 }
 0x13f   :  { %714 = vst [vmem:[#allocation8 + $0x70] sm:$0xff] %v698_v14  ;;  %v623_v16 = vadd.f32 %v894_v61, %v846_v15 }
 0x141   :  { %v699_v17 = vadd.f32 %v1064_v54, %v623_v16 }
 0x143   :  { %715 = vst [vmem:[#allocation8 + $0x78] sm:$0xff] %v699_v17 }
 0x144   :  { %1011 = shalt.err (!%p1008_p0)
}
 0x145   :  { %s1033_s28 = smov 128   ;;  %s1034_s29 = smov 8  }
 0x146   :  { %727 = dma.vmem_to_hbm [thread:$0]  %s722_s26, 2048, %s1088_s3, [#allocation5], %s1033_s28, %s1033_s28, %s1034_s29  }
 0x147   :  { %1024 = dma.done.wait [#allocation5], 2048  }
 0x148   :  { %1025 = vsyncadd [#allocation5], 4294965248 }
 0x149   :  { %731 = vsyncpa [#allocation4], 1 }
 0x14a   :  { %732 = vsyncpa [#allocation7], 1 }
 0x14b   :  { %733 = vsyncpa [#allocation5], 1 }

</bundles_post_ra>
